<compile_context>
chip_gen: v6e
topology: v6e:2x2x1
jax: 0.10.0
libtpu: 0.0.40
codegen_flags: <defaults>
</compile_context>

<pallas_src>
import math
import jax
import jax.numpy as jnp
from jax.experimental import pallas as pl
from jax.experimental.pallas import tpu as pltpu


def _round_up(n, m):
    return ((n + m - 1) // m) * m


def mlp_kernel(x_ref,
               w0_ref, b0_ref,      # firstLinLayer
               w1_ref, b1_ref,      # intermediate linear layer 0
               w2_ref, b2_ref,      # intermediate linear layer 1
               wl_ref, bl_ref,      # lastLinLayer
               out_ref):
    # Whole 4-layer chain fused; only the x/out tiles stream per grid step,
    # weights/biases stay VMEM-resident (index_map -> (0, 0) for every step).
    h = jnp.dot(x_ref[...], w0_ref[...],
                preferred_element_type=jnp.float32) + b0_ref[...]
    h = jnp.maximum(h, 0.0)                        # activation == 'relu'

    h = jnp.dot(h.astype(w1_ref.dtype), w1_ref[...],
                preferred_element_type=jnp.float32) + b1_ref[...]
    h = jnp.maximum(h, 0.0)
    # TODO(synk): nn.Dropout is identity in eval mode; training-time stochastic
    #             dropout (pltpu.prng_*) intentionally not emitted here.

    h = jnp.dot(h.astype(w2_ref.dtype), w2_ref[...],
                preferred_element_type=jnp.float32) + b2_ref[...]
    h = jnp.maximum(h, 0.0)

    out = jnp.dot(h.astype(wl_ref.dtype), wl_ref[...],
                  preferred_element_type=jnp.float32) + bl_ref[...]
    out_ref[...] = out.astype(out_ref.dtype)


def mlp_forward(x, weights_t, biases, *, tile_n_max=16384,
                compute_dtype=jnp.bfloat16):
    """x: (N, inputSize); weights_t[i]: (in_i, out_i); biases[i]: (1, out_i).

    Returns logits of shape (N, out_dim) in float32.
    `compute_dtype` controls the matmul operand dtype (bf16 default, ~1e-2
    relative error; accumulation and biases stay float32).
    """
    N, in_dim = x.shape
    out_dim = weights_t[-1].shape[1]

    # Sublane alignment for the row tile: 16 for 2-byte operands, 8 for f32.
    align = 16 if jnp.dtype(compute_dtype).itemsize == 2 else 8

    # Choose tile_n from N:
    #  * split into cdiv(N, tile_n_max) tiles, but
    #  * use at least 2 tiles when there is enough work so both v7x
    #    TensorCores get a grid step (no-op on single-core v5e/v6e).
    n_rows = _round_up(N, align)
    num_tiles = pl.cdiv(n_rows, tile_n_max)
    if num_tiles == 1 and n_rows >= 2 * align:
        num_tiles = 2
    tile_n = _round_up(pl.cdiv(n_rows, num_tiles), align)
    grid_n = pl.cdiv(n_rows, tile_n)
    n_pad = tile_n * grid_n

    # Only row-pad (cheap: in_dim real columns, <= tile_n-1 junk rows).
    xp = x.astype(compute_dtype)
    if n_pad != N:
        xp = jnp.pad(xp, ((0, n_pad - N), (0, 0)))

    args = [xp]
    in_specs = [pl.BlockSpec((tile_n, in_dim), lambda i: (i, 0))]
    for w, b in zip(weights_t, biases):
        args.append(w.astype(compute_dtype))
        args.append(b.astype(jnp.float32).reshape(1, -1))
        # Weights/biases: full-array blocks, same (0, 0) block every grid step
        # -> VMEM-resident across the whole grid.
        in_specs.append(pl.BlockSpec(w.shape, lambda i: (0, 0)))
        in_specs.append(pl.BlockSpec((1, b.shape[-1]), lambda i: (0, 0)))

    out_padded = pl.pallas_call(
        mlp_kernel,
        grid=(grid_n,),
        in_specs=in_specs,
        # Narrow output: last dim equals the full array dim, so only the real
        # logits (8 B/row) are written back.
        out_specs=pl.BlockSpec((tile_n, out_dim), lambda i: (i, 0)),
        out_shape=jax.ShapeDtypeStruct((n_pad, out_dim), jnp.float32),
        compiler_params=pltpu.CompilerParams(
            dimension_semantics=("parallel",)),   # shard N tiles across v7x cores
    )(*args)

    if n_pad != N:
        out_padded = out_padded[:N]
    return out_padded


def init_linear(key, fan_in, fan_out):
    """Deterministic init mimicking torch.nn.Linear default:
    U(-1/sqrt(fan_in), 1/sqrt(fan_in)). Weight returned pre-transposed to
    (fan_in, fan_out); bias as (1, fan_out)."""
    kw, kb = jax.random.split(key)
    bound = 1.0 / math.sqrt(fan_in)
    w_t = jax.random.uniform(kw, (fan_in, fan_out), jnp.float32, -bound, bound)
    b = jax.random.uniform(kb, (1, fan_out), jnp.float32, -bound, bound)
    return w_t, b


def reference_forward(x, weights_t, biases):
    h = x
    n = len(weights_t)
    for i, (w, b) in enumerate(zip(weights_t, biases)):
        h = h @ w + b
        if i < n - 1:
            h = jnp.maximum(h, 0.0)
    return h


if __name__ == "__main__":
    # Configuration implied by the module after .fit():
    #   inputSize = 8, linearLayerSizes = [(2, 2), (2, 2)]
    #   firstLinLayer: 8 -> 16, intermediates: 16 -> 16, 16 -> 16, lastLinLayer: 16 -> 2
    inputSize, hidden, nClasses = 8, 16, 2

    key = jax.random.PRNGKey(0)
    kx, k0, k1, k2, kl = jax.random.split(key, 5)

    w0, b0 = init_linear(k0, inputSize, hidden)   # firstLinLayer
    w1, b1 = init_linear(k1, hidden, hidden)      # intermediate linear layer 0
    w2, b2 = init_linear(k2, hidden, hidden)      # intermediate linear layer 1
    wl, bl = init_linear(kl, hidden, nClasses)    # lastLinLayer
    weights_t = [w0, w1, w2, wl]
    biases = [b0, b1, b2, bl]

    # Case 1: small batch, default bf16 operand path (f32 accumulation).
    x_small = jax.random.normal(kx, (16, inputSize), jnp.float32)
    out_small = jax.block_until_ready(mlp_forward(x_small, weights_t, biases))
    ref_small = reference_forward(x_small, weights_t, biases)
    assert out_small.shape == (16, nClasses)
    assert jnp.allclose(out_small, ref_small, atol=3e-2, rtol=3e-2), \
        "Pallas output mismatch vs JAX reference (bf16 path)"

    # Case 2: exercise the multi-tile parallel grid + row padding with exact
    # f32 compute (N=40 rows, tile_n_max=16 -> 3 grid steps, 8 padded rows).
    x_big = jax.random.normal(kx, (40, inputSize), jnp.float32)
    out_big = jax.block_until_ready(
        mlp_forward(x_big, weights_t, biases, tile_n_max=16,
                    compute_dtype=jnp.float32))
    ref_big = reference_forward(x_big, weights_t, biases)
    assert out_big.shape == (40, nClasses)
    assert jnp.allclose(out_big, ref_big, atol=1e-5, rtol=1e-5), \
        "Pallas output mismatch vs JAX reference (tiled f32 path)"

    print("KERNEL_OK")
</pallas_src>

<mosaic_0001>
module attributes {stable_mosaic.version = 11 : i64} {
  func.func @mlp_kernel(%arg0: i32, %arg1: memref<16x8xbf16, #tpu.memory_space<vmem>>, %arg2: memref<8x16xbf16, #tpu.memory_space<vmem>>, %arg3: memref<1x16xf32, #tpu.memory_space<vmem>>, %arg4: memref<16x16xbf16, #tpu.memory_space<vmem>>, %arg5: memref<1x16xf32, #tpu.memory_space<vmem>>, %arg6: memref<16x16xbf16, #tpu.memory_space<vmem>>, %arg7: memref<1x16xf32, #tpu.memory_space<vmem>>, %arg8: memref<16x2xbf16, #tpu.memory_space<vmem>>, %arg9: memref<1x2xf32, #tpu.memory_space<vmem>>, %arg10: memref<16x2xf32, #tpu.memory_space<vmem>>) attributes {dimension_semantics = [#tpu.dimension_semantics<parallel>], iteration_bounds = array<i64: 1>, scalar_prefetch = 0 : i64, scratch_operands = 0 : i64, tpu.core_type = #tpu.core_type<tc>, window_params = [{transform_indices = @transform_0, window_bounds = array<i64: 16, 8>}, {pipeline_mode = #tpu.pipeline_mode<synchronous>, transform_indices = @transform_1, window_bounds = array<i64: 8, 16>}, {pipeline_mode = #tpu.pipeline_mode<synchronous>, transform_indices = @transform_2, window_bounds = array<i64: 1, 16>}, {pipeline_mode = #tpu.pipeline_mode<synchronous>, transform_indices = @transform_3, window_bounds = array<i64: 16, 16>}, {pipeline_mode = #tpu.pipeline_mode<synchronous>, transform_indices = @transform_4, window_bounds = array<i64: 1, 16>}, {pipeline_mode = #tpu.pipeline_mode<synchronous>, transform_indices = @transform_5, window_bounds = array<i64: 16, 16>}, {pipeline_mode = #tpu.pipeline_mode<synchronous>, transform_indices = @transform_6, window_bounds = array<i64: 1, 16>}, {pipeline_mode = #tpu.pipeline_mode<synchronous>, transform_indices = @transform_7, window_bounds = array<i64: 16, 2>}, {pipeline_mode = #tpu.pipeline_mode<synchronous>, transform_indices = @transform_8, window_bounds = array<i64: 1, 2>}, {transform_indices = @transform_9, window_bounds = array<i64: 16, 2>}]} {
    %c0 = arith.constant 0 : index
    %c0_0 = arith.constant 0 : index
    %0 = vector.load %arg1[%c0, %c0_0] : memref<16x8xbf16, #tpu.memory_space<vmem>>, vector<16x8xbf16>
    %c0_1 = arith.constant 0 : index
    %c0_2 = arith.constant 0 : index
    %1 = vector.load %arg2[%c0_1, %c0_2] : memref<8x16xbf16, #tpu.memory_space<vmem>>, vector<8x16xbf16>
    %cst = arith.constant dense<0.000000e+00> : vector<16x16xf32>
    %2 = tpu.matmul %0, %1, %cst {dimension_numbers = #tpu.dot_dimension_numbers<[1], [0], [0], [1], [0, 0, 1, 1], [], []>} : vector<16x8xbf16>, vector<8x16xbf16>, vector<16x16xf32> -> vector<16x16xf32>
    %c0_3 = arith.constant 0 : index
    %c0_4 = arith.constant 0 : index
    %3 = vector.load %arg3[%c0_3, %c0_4] : memref<1x16xf32, #tpu.memory_space<vmem>>, vector<1x16xf32>
    %4 = vector.broadcast %3 : vector<1x16xf32> to vector<16x16xf32>
    %5 = arith.addf %2, %4 : vector<16x16xf32>
    %cst_5 = arith.constant 0.000000e+00 : f32
    %6 = vector.broadcast %cst_5 : f32 to vector<16x16xf32>
    %7 = arith.maximumf %5, %6 : vector<16x16xf32>
    %8 = arith.truncf %7 : vector<16x16xf32> to vector<16x16xbf16>
    %c0_6 = arith.constant 0 : index
    %c0_7 = arith.constant 0 : index
    %9 = vector.load %arg4[%c0_6, %c0_7] : memref<16x16xbf16, #tpu.memory_space<vmem>>, vector<16x16xbf16>
    %cst_8 = arith.constant dense<0.000000e+00> : vector<16x16xf32>
    %10 = tpu.matmul %8, %9, %cst_8 {dimension_numbers = #tpu.dot_dimension_numbers<[1], [0], [0], [1], [0, 0, 1, 1], [], []>} : vector<16x16xbf16>, vector<16x16xbf16>, vector<16x16xf32> -> vector<16x16xf32>
    %c0_9 = arith.constant 0 : index
    %c0_10 = arith.constant 0 : index
    %11 = vector.load %arg5[%c0_9, %c0_10] : memref<1x16xf32, #tpu.memory_space<vmem>>, vector<1x16xf32>
    %12 = vector.broadcast %11 : vector<1x16xf32> to vector<16x16xf32>
    %13 = arith.addf %10, %12 : vector<16x16xf32>
    %cst_11 = arith.constant 0.000000e+00 : f32
    %14 = vector.broadcast %cst_11 : f32 to vector<16x16xf32>
    %15 = arith.maximumf %13, %14 : vector<16x16xf32>
    %16 = arith.truncf %15 : vector<16x16xf32> to vector<16x16xbf16>
    %c0_12 = arith.constant 0 : index
    %c0_13 = arith.constant 0 : index
    %17 = vector.load %arg6[%c0_12, %c0_13] : memref<16x16xbf16, #tpu.memory_space<vmem>>, vector<16x16xbf16>
    %cst_14 = arith.constant dense<0.000000e+00> : vector<16x16xf32>
    %18 = tpu.matmul %16, %17, %cst_14 {dimension_numbers = #tpu.dot_dimension_numbers<[1], [0], [0], [1], [0, 0, 1, 1], [], []>} : vector<16x16xbf16>, vector<16x16xbf16>, vector<16x16xf32> -> vector<16x16xf32>
    %c0_15 = arith.constant 0 : index
    %c0_16 = arith.constant 0 : index
    %19 = vector.load %arg7[%c0_15, %c0_16] : memref<1x16xf32, #tpu.memory_space<vmem>>, vector<1x16xf32>
    %20 = vector.broadcast %19 : vector<1x16xf32> to vector<16x16xf32>
    %21 = arith.addf %18, %20 : vector<16x16xf32>
    %cst_17 = arith.constant 0.000000e+00 : f32
    %22 = vector.broadcast %cst_17 : f32 to vector<16x16xf32>
    %23 = arith.maximumf %21, %22 : vector<16x16xf32>
    %24 = arith.truncf %23 : vector<16x16xf32> to vector<16x16xbf16>
    %c0_18 = arith.constant 0 : index
    %c0_19 = arith.constant 0 : index
    %25 = vector.load %arg8[%c0_18, %c0_19] : memref<16x2xbf16, #tpu.memory_space<vmem>>, vector<16x2xbf16>
    %cst_20 = arith.constant dense<0.000000e+00> : vector<16x2xf32>
    %26 = tpu.matmul %24, %25, %cst_20 {dimension_numbers = #tpu.dot_dimension_numbers<[1], [0], [0], [1], [0, 0, 1, 1], [], []>} : vector<16x16xbf16>, vector<16x2xbf16>, vector<16x2xf32> -> vector<16x2xf32>
    %c0_21 = arith.constant 0 : index
    %c0_22 = arith.constant 0 : index
    %27 = vector.load %arg9[%c0_21, %c0_22] : memref<1x2xf32, #tpu.memory_space<vmem>>, vector<1x2xf32>
    %28 = vector.broadcast %27 : vector<1x2xf32> to vector<16x2xf32>
    %29 = arith.addf %26, %28 : vector<16x2xf32>
    %c0_23 = arith.constant 0 : index
    %c0_24 = arith.constant 0 : index
    %30 = vector.load %arg10[%c0_23, %c0_24] : memref<16x2xf32, #tpu.memory_space<vmem>>, vector<16x2xf32>
    tpu.vector_store %arg10[%c0_23, %c0_24], %29 {strides = array<i32>} : memref<16x2xf32, #tpu.memory_space<vmem>>, vector<16x2xf32>,
    return
  }
  func.func @transform_0(%arg0: i32) -> (i32, i32) {
    %c0_i32 = arith.constant 0 : i32
    %c0_i32_0 = arith.constant 0 : i32
    return %arg0, %c0_i32 : i32, i32
  }
  func.func @transform_1(%arg0: i32) -> (i32, i32) {
    %c0_i32 = arith.constant 0 : i32
    %c0_i32_0 = arith.constant 0 : i32
    %c0_i32_1 = arith.constant 0 : i32
    return %c0_i32, %c0_i32_0 : i32, i32
  }
  func.func @transform_2(%arg0: i32) -> (i32, i32) {
    %c0_i32 = arith.constant 0 : i32
    %c0_i32_0 = arith.constant 0 : i32
    %c0_i32_1 = arith.constant 0 : i32
    return %c0_i32, %c0_i32_0 : i32, i32
  }
  func.func @transform_3(%arg0: i32) -> (i32, i32) {
    %c0_i32 = arith.constant 0 : i32
    %c0_i32_0 = arith.constant 0 : i32
    %c0_i32_1 = arith.constant 0 : i32
    return %c0_i32, %c0_i32_0 : i32, i32
  }
  func.func @transform_4(%arg0: i32) -> (i32, i32) {
    %c0_i32 = arith.constant 0 : i32
    %c0_i32_0 = arith.constant 0 : i32
    %c0_i32_1 = arith.constant 0 : i32
    return %c0_i32, %c0_i32_0 : i32, i32
  }
  func.func @transform_5(%arg0: i32) -> (i32, i32) {
    %c0_i32 = arith.constant 0 : i32
    %c0_i32_0 = arith.constant 0 : i32
    %c0_i32_1 = arith.constant 0 : i32
    return %c0_i32, %c0_i32_0 : i32, i32
  }
  func.func @transform_6(%arg0: i32) -> (i32, i32) {
    %c0_i32 = arith.constant 0 : i32
    %c0_i32_0 = arith.constant 0 : i32
    %c0_i32_1 = arith.constant 0 : i32
    return %c0_i32, %c0_i32_0 : i32, i32
  }
  func.func @transform_7(%arg0: i32) -> (i32, i32) {
    %c0_i32 = arith.constant 0 : i32
    %c0_i32_0 = arith.constant 0 : i32
    %c0_i32_1 = arith.constant 0 : i32
    return %c0_i32, %c0_i32_0 : i32, i32
  }
  func.func @transform_8(%arg0: i32) -> (i32, i32) {
    %c0_i32 = arith.constant 0 : i32
    %c0_i32_0 = arith.constant 0 : i32
    %c0_i32_1 = arith.constant 0 : i32
    return %c0_i32, %c0_i32_0 : i32, i32
  }
  func.func @transform_9(%arg0: i32) -> (i32, i32) {
    %c0_i32 = arith.constant 0 : i32
    %c0_i32_0 = arith.constant 0 : i32
    return %arg0, %c0_i32 : i32, i32
  }
}

</mosaic_0001>

<bundles_post_ra>
// kernel: tpu_custom_call.1
= control target key start
LH: loop header
LB: loop body
LE: loop exit
PB: predicated region body
PF: predicated region fallthrough
CT: control target
= control target key end

     0   :  { %vm52_vm0 = vcmask 1043456   ;;  %v341_v0 = vmov 0.0   ;;  %vm342_vm1 = vmmov 0   ;;  %vm48_vm2 = vcmask 64512   ;;  %s433_s1 = inlined_call_operand.vmem [shape: bf16[8,16], index: 1, kind: input, shape index: {}]   ;;  %s434_s0 = inlined_call_operand.vmem [shape: bf16[16,8], index: 0, kind: input, shape index: {}]   ;;  %s435_s3 = inlined_call_operand.vmem [shape: bf16[16,16], index: 3, kind: input, shape index: {}]   ;;  %s436_s2 = inlined_call_operand.vmem [shape: f32[1,16], index: 2, kind: input, shape index: {}]   ;;  %s437_s5 = inlined_call_operand.vmem [shape: bf16[16,16], index: 5, kind: input, shape index: {}]   ;;  %s438_s4 = inlined_call_operand.vmem [shape: f32[1,16], index: 4, kind: input, shape index: {}]   ;;  %s439_s7 = inlined_call_operand.vmem [shape: bf16[16,2], index: 7, kind: input, shape index: {}]   ;;  %s440_s6 = inlined_call_operand.vmem [shape: f32[1,16], index: 6, kind: input, shape index: {}]   ;;  %s441_s8 = inlined_call_operand.vmem [shape: f32[1,2], index: 8, kind: input, shape index: {}]   ;;  %s442_s9 = inlined_call_operand.vmem [shape: f32[16,2], index: 9, kind: output, shape index: {}]  }
   0x1   :  { %311 = vmatprep.subr.bf16.mxu0 %v341_v0  ;;  %v35_v1 = vld [vmem:[%s433_s1] sm:$0xf]  ;;  %313 = vmatprep.mubr.msk.bf16.mxu0 %vm342_vm1, %v341_v0  ;;  %vm115_vm3 = vcmask 130048   ;;  %vm284_vm4 = vcmask 15360  }
   0x2   :  { %v54_v2 = vsel %vm52_vm0, %v35_v1, 0  ;;  %v337_v3 = vld [vmem:[%s434_s0] sm:$0xff]   ;;  %317 = vmatprep.subr.bf16.mxu1 %v341_v0  ;;  %319 = vmatprep.mubr.msk.bf16.mxu1 %vm342_vm1, %v341_v0 }
   0x3   :  { %312 = vmatpush3.bf16.msra.mxu0 %v54_v2  ;;  %v338_v4 = vld [vmem:[%s435_s3] sm:$0xff]  }
   0x4   :  { %323 = vmatprep.subr.bf16.mxu0 %v341_v0  ;;  %318 = vmatpush3.bf16.msra.mxu1 %v338_v4  ;;  %v291_v5 = vld [vmem:[%s436_s2] ss:$0 sm:$0xff] }
   0x5   :  { %329 = vmatprep.subr.bf16.mxu1 %v341_v0  ;;  %v339_v15 = vld [vmem:[%s437_s5] sm:$0xff]  }
   0x6   :  { %314 = vmatmul.mubr.msk.bf16.vlgmr.msra.gmra.mxu0 %vm48_vm2, %v337_v3  ;;  %v294_v16 = vld [vmem:[%s438_s4] ss:$0 sm:$0xff] }
   0x7   :  { %325 = vmatprep.mubr.msk.bf16.mxu0 %vm342_vm1, %v341_v0  ;;  %324 = vmatpush3.bf16.msra.mxu0 %v339_v15  ;;  %v340_v26 = vld [vmem:[%s439_s7] sm:$0xff]  }
   0x8   :  { %v297_v27 = vld [vmem:[%s440_s6] ss:$0 sm:$0xff] }
   0x9   :  { %v300_v37 = vld [vmem:[%s441_s8] ss:$0 sm:$0xff] }
  0xc6   :  { %v90_v6 = vpop.f32.mrf.mxu0 }
  0xc7   :  { %v91_v8 = vadd.f32 %v291_v5, %v90_v6 }
  0xc8   :  { %v315_v7 = vpop.f32.mrf.mxu0 }
  0xc9   :  { %v97_v12 = vmax.f32 %v91_v8, 0.0 }
  0xca   :  { %v93_v9 = vpop.f32.mrf.mxu0 }
  0xcb   :  { %v94_v10 = vadd.f32 %v291_v5, %v93_v9 }
  0xcc   :  { %v316_v11 = vpop.f32.mrf.mxu0 }
  0xcd   :  { %v98_v13 = vmax.f32 %v94_v10, 0.0 }
  0xcf   :  { %v99_v14 = vpack.c.bf16 %v98_v13, %v97_v12 }
  0xd1   :  { %320 = vmatmul.mubr.msk.bf16.vlgmr.msra.gmra.mxu1 %vm115_vm3, %v99_v14 }
  0xd2   :  { %331 = vmatprep.mubr.msk.bf16.mxu1 %vm342_vm1, %v341_v0  ;;  %330 = vmatpush3.bf16.msra.mxu1 %v340_v26 }
 0x191   :  { %v153_v17 = vpop.f32.mrf.mxu1 }
 0x192   :  { %v154_v19 = vadd.f32 %v294_v16, %v153_v17 }
 0x193   :  { %v321_v18 = vpop.f32.mrf.mxu1 }
 0x194   :  { %v160_v23 = vmax.f32 %v154_v19, 0.0 }
 0x195   :  { %v156_v20 = vpop.f32.mrf.mxu1 }
 0x196   :  { %v157_v21 = vadd.f32 %v294_v16, %v156_v20 }
 0x197   :  { %v322_v22 = vpop.f32.mrf.mxu1 }
 0x198   :  { %v161_v24 = vmax.f32 %v157_v21, 0.0 }
 0x19a   :  { %v162_v25 = vpack.c.bf16 %v161_v24, %v160_v23 }
 0x19c   :  { %326 = vmatmul.mubr.msk.bf16.vlgmr.msra.gmra.mxu0 %vm115_vm3, %v162_v25 }
 0x25c   :  { %v215_v28 = vpop.f32.mrf.mxu0 }
 0x25d   :  { %v216_v30 = vadd.f32 %v297_v27, %v215_v28 }
 0x25e   :  { %v327_v29 = vpop.f32.mrf.mxu0 }
 0x25f   :  { %v222_v34 = vmax.f32 %v216_v30, 0.0 }
 0x260   :  { %v218_v31 = vpop.f32.mrf.mxu0 }
 0x261   :  { %v219_v32 = vadd.f32 %v297_v27, %v218_v31 }
 0x262   :  { %v328_v33 = vpop.f32.mrf.mxu0 }
 0x263   :  { %v223_v35 = vmax.f32 %v219_v32, 0.0 }
 0x265   :  { %v224_v36 = vpack.c.bf16 %v223_v35, %v222_v34 }
 0x267   :  { %332 = vmatmul.mubr.msk.bf16.vlgmr.msra.gmra.mxu1 %vm115_vm3, %v224_v36 }
 0x327   :  { %v277_v38 = vpop.f32.mrf.mxu1 }
 0x328   :  { %v278_v39 = vadd.f32 %v300_v37, %v277_v38 }
 0x329   :  { %v333_v40 = vpop.f32.mrf.mxu1 }
 0x32a   :  { %285 = vst.msk [vmem:[%s442_s9] sm:$0xff] %vm284_vm4, %v278_v39 }
 0x32b   :  { %v280_v41 = vpop.f32.mrf.mxu1 }
 0x32c   :  { %v281_v42 = vadd.f32 %v300_v37, %v280_v41 }
 0x32d   :  { %v334_v43 = vpop.f32.mrf.mxu1 }
 0x32e   :  { %286 = vst.msk [vmem:[%s442_s9 + $0x8] sm:$0xff] %vm284_vm4, %v281_v42 }

</bundles_post_ra>
